<compile_context>
chip_gen: v5e
topology: v5e:2x2
jax: 0.10.0
libtpu: 0.0.40
codegen_flags: <defaults>
</compile_context>

<pallas_src>
import functools
import math

import jax
import jax.numpy as jnp
from jax import lax
from jax.experimental import pallas as pl
from jax.experimental.pallas import tpu as pltpu

# Finite "minus infinity" used both for kv padding of the additive mask and for
# the running-max initialization (finite so exp(m_prev - m_new) never sees
# inf - inf).  Representable in bf16.
_MASK_PAD = -1e30

# Tiles in this kernel need only a few MiB; 48 MiB leaves double-buffering
# headroom while staying under v7x's 64 MiB physical VMEM.
_VMEM_LIMIT = 48 * 1024 * 1024

# k/v are kept fully VMEM-resident per batch element when their double-buffered
# bf16 footprint stays under this budget (conservative so the same config also
# fits v7x's 64 MiB VMEM alongside q/mask/out blocks and scratch).
_KV_RESIDENT_BUDGET = 16 * 1024 * 1024


def _round_up(x, m):
    return ((x + m - 1) // m) * m


# ----------------------------------------------------------------------------
# Kernel 1: fused q/k/v projections over a (batch, seq-tile) grid.
# Block shapes: x* (1, TS, D*p) bf16, w*T (D*p, Hp) bf16, outputs (1, TS, Hp) bf16.
# ----------------------------------------------------------------------------
def _qkv_proj_kernel(x1_ref, x2_ref, x3_ref, wq_ref, wk_ref, wv_ref,
                     q_ref, k_ref, v_ref, *, scale):
    # bf16 x bf16 -> f32 accumulation on the MXU.
    q = jnp.dot(x1_ref[0], wq_ref[...], preferred_element_type=jnp.float32)
    # Fold 1/sqrt(hidden_dim) into q here (S*H elements) instead of scaling the
    # (S,S) score matrix later.
    q_ref[0] = (q * scale).astype(q_ref.dtype)
    k_ref[0] = jnp.dot(x2_ref[0], wk_ref[...],
                       preferred_element_type=jnp.float32).astype(k_ref.dtype)
    v_ref[0] = jnp.dot(x3_ref[0], wv_ref[...],
                       preferred_element_type=jnp.float32).astype(v_ref.dtype)


# ----------------------------------------------------------------------------
# Kernel 2: flash attention with additive mask over a (batch, q-tile, kv-tile)
# grid.  q is pre-scaled and bf16; k/v are bf16 and either VMEM-resident per
# batch (sliced with pl.ds) or streamed per kv tile.  Scratch: running max m,
# running sum l, f32 accumulator.
# ----------------------------------------------------------------------------
def _flash_attn_kernel(q_ref, k_ref, v_ref, mask_ref, o_ref, m_sc, l_sc, acc_sc,
                       *, blk, kv_resident):
    ki = pl.program_id(2)

    @pl.when(ki == 0)
    def _init():
        m_sc[...] = jnp.full_like(m_sc, _MASK_PAD)
        l_sc[...] = jnp.zeros_like(l_sc)
        acc_sc[...] = jnp.zeros_like(acc_sc)

    q = q_ref[0]                                   # (TQ, Hp) bf16, already * 1/sqrt(H)
    if kv_resident:
        off = pl.multiple_of(ki * blk, blk)
        k = k_ref[0, pl.ds(off, blk), :]           # (TK, Hp) bf16, VMEM-resident slab
        v = v_ref[0, pl.ds(off, blk), :]
    else:
        k = k_ref[0]                               # (TK, Hp) bf16, streamed tile
        v = v_ref[0]

    # Contract the last axis of both operands directly -- no k.T / XLU transpose.
    s = lax.dot_general(q, k, dimension_numbers=(((1,), (1,)), ((), ())),
                        preferred_element_type=jnp.float32)      # (TQ, TK) f32
    s = s + mask_ref[0].astype(jnp.float32)

    m_prev = m_sc[...]                                            # (TQ, 1) f32
    m_new = jnp.maximum(m_prev, jnp.max(s, axis=-1, keepdims=True))
    alpha = jnp.exp(m_prev - m_new)
    p = jnp.exp(s - m_new)                                        # (TQ, TK) f32

    l_sc[...] = alpha * l_sc[...] + jnp.sum(p, axis=-1, keepdims=True)
    acc_sc[...] = alpha * acc_sc[...] + jnp.dot(
        p.astype(jnp.bfloat16), v, preferred_element_type=jnp.float32)
    m_sc[...] = m_new

    @pl.when(ki == pl.num_programs(2) - 1)
    def _finalize():
        # Single normalization per q row at the end ((TQ,Hp) multiply, not
        # (TQ,TK)).  approx=True lowers to the otherwise-idle EUP vrcp slot.
        inv_l = pl.reciprocal(l_sc[...], approx=True)
        o_ref[0] = (acc_sc[...] * inv_l).astype(o_ref.dtype)


# ----------------------------------------------------------------------------
# Wrapper.
#   x1:[B,S,D1] x2:[B,S,D2] x3:[B,S,D3] mask:[B,S,S]
#   wq:[H,D1] wk:[H,D2] wv:[H,D3]   (PyTorch nn.Linear weight layout)
# Output: [B,S,H] float32.
# ----------------------------------------------------------------------------
def self_attention(x1, x2, x3, mask, wq, wk, wv, *, block_seq=512,
                   kv_resident=None):
    bf16 = jnp.bfloat16
    f32 = jnp.float32
    B, S, D1 = x1.shape
    D2 = x2.shape[-1]
    D3 = x3.shape[-1]
    H = wq.shape[0]
    scale = 1.0 / math.sqrt(float(H))        # uses the ORIGINAL hidden_dim

    # Lane-dense padded sizes.  Zero padding on D/H is exact (contributes 0 to
    # matmuls); kv padding uses a large negative additive mask so softmax
    # ignores padded keys.  blk is a multiple of 128 and divides Sp exactly.
    blk = min(_round_up(block_seq, 128), _round_up(S, 128))
    Sp = _round_up(S, blk)
    D1p, D2p, D3p = (_round_up(d, 128) for d in (D1, D2, D3))
    Hp = _round_up(H, 128)
    n_s = Sp // blk

    if kv_resident is None:
        # k + v, double-buffered, bf16, per batch element.
        kv_resident = (2 * 2 * Sp * Hp * 2) <= _KV_RESIDENT_BUDGET

    # bf16 in HBM for everything the MXU consumes (halves the HBM streams).
    x1p = jnp.pad(x1.astype(bf16), ((0, 0), (0, Sp - S), (0, D1p - D1)))
    x2p = jnp.pad(x2.astype(bf16), ((0, 0), (0, Sp - S), (0, D2p - D2)))
    x3p = jnp.pad(x3.astype(bf16), ((0, 0), (0, Sp - S), (0, D3p - D3)))
    maskp = jnp.pad(mask.astype(bf16), ((0, 0), (0, Sp - S), (0, Sp - S)),
                    constant_values=_MASK_PAD)

    # In a real model these transposed/padded bf16 weights would be stored once
    # as parameters; here it is per-call glue outside the kernels.
    wq_t = jnp.pad(wq.astype(bf16).T, ((0, D1p - D1), (0, Hp - H)))
    wk_t = jnp.pad(wk.astype(bf16).T, ((0, D2p - D2), (0, Hp - H)))
    wv_t = jnp.pad(wv.astype(bf16).T, ((0, D3p - D3), (0, Hp - H)))

    # ---------------- projections: grid (B, seq-tile) --------------------------
    proj_cost = pl.CostEstimate(
        flops=2 * B * Sp * (D1p + D2p + D3p) * Hp,
        transcendentals=0,
        bytes_accessed=2 * (B * Sp * (D1p + D2p + D3p)
                            + (D1p + D2p + D3p) * Hp
                            + 3 * B * Sp * Hp),
    )
    q, k, v = pl.pallas_call(
        functools.partial(_qkv_proj_kernel, scale=scale),
        out_shape=(jax.ShapeDtypeStruct((B, Sp, Hp), bf16),) * 3,
        grid_spec=pltpu.PrefetchScalarGridSpec(
            num_scalar_prefetch=0,
            grid=(B, n_s),
            in_specs=[
                pl.BlockSpec((1, blk, D1p), lambda b, s: (b, s, 0)),
                pl.BlockSpec((1, blk, D2p), lambda b, s: (b, s, 0)),
                pl.BlockSpec((1, blk, D3p), lambda b, s: (b, s, 0)),
                pl.BlockSpec((D1p, Hp), lambda b, s: (0, 0)),
                pl.BlockSpec((D2p, Hp), lambda b, s: (0, 0)),
                pl.BlockSpec((D3p, Hp), lambda b, s: (0, 0)),
            ],
            out_specs=[
                pl.BlockSpec((1, blk, Hp), lambda b, s: (b, s, 0)),
                pl.BlockSpec((1, blk, Hp), lambda b, s: (b, s, 0)),
                pl.BlockSpec((1, blk, Hp), lambda b, s: (b, s, 0)),
            ]),
        compiler_params=pltpu.CompilerParams(
            dimension_semantics=("parallel", "parallel"),
            vmem_limit_bytes=_VMEM_LIMIT),
        cost_estimate=proj_cost,
    )(x1p, x2p, x3p, wq_t, wk_t, wv_t)

    # ---------------- attention: grid (B, q-tile, kv-tile) ---------------------
    if kv_resident:
        # Block index constant across (qi, ki): k/v fetched once per batch and
        # stay VMEM-resident; sliced with pl.ds inside the kernel.
        kv_spec = pl.BlockSpec((1, Sp, Hp), lambda b, qi, ki: (b, 0, 0))
        kv_reads = 2 * B * Sp * Hp            # elements, read once
    else:
        kv_spec = pl.BlockSpec((1, blk, Hp), lambda b, qi, ki: (b, ki, 0))
        kv_reads = 2 * n_s * B * Sp * Hp      # re-streamed once per q tile

    flash_cost = pl.CostEstimate(
        flops=4 * B * Sp * Sp * Hp,
        transcendentals=B * Sp * Sp,
        bytes_accessed=(2 * B * Sp * Hp          # q (bf16)
                        + 2 * kv_reads           # k + v (bf16)
                        + 2 * B * Sp * Sp        # mask (bf16)
                        + 4 * B * Sp * Hp),      # output (f32)
    )
    out = pl.pallas_call(
        functools.partial(_flash_attn_kernel, blk=blk, kv_resident=kv_resident),
        out_shape=jax.ShapeDtypeStruct((B, Sp, Hp), f32),
        grid_spec=pltpu.PrefetchScalarGridSpec(
            num_scalar_prefetch=0,
            grid=(B, n_s, n_s),
            in_specs=[
                pl.BlockSpec((1, blk, Hp), lambda b, qi, ki: (b, qi, 0)),
                kv_spec,                      # k
                kv_spec,                      # v
                pl.BlockSpec((1, blk, blk), lambda b, qi, ki: (b, qi, ki)),
            ],
            out_specs=pl.BlockSpec((1, blk, Hp), lambda b, qi, ki: (b, qi, 0)),
            scratch_shapes=[
                pltpu.VMEM((blk, 1), jnp.float32),    # running max m
                pltpu.VMEM((blk, 1), jnp.float32),    # running sum l
                pltpu.VMEM((blk, Hp), jnp.float32),   # output accumulator
            ]),
        compiler_params=pltpu.CompilerParams(
            dimension_semantics=("parallel", "parallel", "arbitrary"),
            vmem_limit_bytes=_VMEM_LIMIT),
        cost_estimate=flash_cost,
    )(q, k, v, maskp)

    return out[:, :S, :H]


# ----------------------------------------------------------------------------
# Pure-JAX f32 reference matching the PyTorch forward exactly.
# ----------------------------------------------------------------------------
def _reference(x1, x2, x3, mask, wq, wk, wv):
    q = x1 @ wq.T
    k = x2 @ wk.T
    v = x3 @ wv.T
    h = wq.shape[0]
    scores = jnp.einsum("bqh,bkh->bqk", q, k) / jnp.sqrt(jnp.float32(h))
    weights = jax.nn.softmax(scores + mask, axis=-1)
    return jnp.einsum("bqk,bkh->bqh", weights, v)


def _run_case(key, B, S, dims, H, block_seq, kv_resident=None):
    D1, D2, D3 = dims
    k1, k2, k3, km, kwq, kwk, kwv = jax.random.split(key, 7)
    x1 = jax.random.normal(k1, (B, S, D1), dtype=jnp.float32)
    x2 = jax.random.normal(k2, (B, S, D2), dtype=jnp.float32)
    x3 = jax.random.normal(k3, (B, S, D3), dtype=jnp.float32)
    mask = jax.random.normal(km, (B, S, S), dtype=jnp.float32)
    wq = jax.random.normal(kwq, (H, D1), dtype=jnp.float32) * (1.0 / math.sqrt(D1))
    wk = jax.random.normal(kwk, (H, D2), dtype=jnp.float32) * (1.0 / math.sqrt(D2))
    wv = jax.random.normal(kwv, (H, D3), dtype=jnp.float32) * (1.0 / math.sqrt(D3))

    out = self_attention(x1, x2, x3, mask, wq, wk, wv,
                         block_seq=block_seq, kv_resident=kv_resident)
    out = jax.block_until_ready(out)
    ref = _reference(x1, x2, x3, mask, wq, wk, wv)

    assert out.shape == (B, S, H), out.shape
    err = float(jnp.max(jnp.abs(out - ref)))
    # bf16 MXU operands / bf16 q,k,v,mask -> ~1e-2 relative agreement.
    assert jnp.allclose(out, ref, atol=5e-2, rtol=5e-2), f"max abs err = {err}"
    return err


if __name__ == "__main__":
    key = jax.random.PRNGKey(0)
    k_a, k_b, k_c = jax.random.split(key, 3)

    # Case 1: tiny module-like shapes (B=2, S=8, input_dims=(16,24,8), H=32);
    # exercises the padding path (S, D, H all padded to lane-dense sizes).
    _run_case(k_a, B=2, S=8, dims=(16, 24, 8), H=32, block_seq=512)

    # Case 2: lane-dense shapes, multiple kv tiles, k/v VMEM-resident per batch
    # (online-softmax accumulation across the "arbitrary" kv axis).
    _run_case(k_b, B=2, S=384, dims=(128, 128, 128), H=128, block_seq=128)

    # Case 3: same shapes but force the streamed (non-resident) k/v path.
    _run_case(k_c, B=2, S=384, dims=(128, 128, 128), H=128, block_seq=128,
              kv_resident=False)

    print("KERNEL_OK")
</pallas_src>

<mosaic_0001>
module attributes {stable_mosaic.version = 11 : i64} {
  func.func @_qkv_proj_kernel(%arg0: i32, %arg1: i32, %arg2: memref<1x128x128xbf16, #tpu.memory_space<vmem>>, %arg3: memref<1x128x128xbf16, #tpu.memory_space<vmem>>, %arg4: memref<1x128x128xbf16, #tpu.memory_space<vmem>>, %arg5: memref<128x128xbf16, #tpu.memory_space<vmem>>, %arg6: memref<128x128xbf16, #tpu.memory_space<vmem>>, %arg7: memref<128x128xbf16, #tpu.memory_space<vmem>>, %arg8: memref<1x128x128xbf16, #tpu.memory_space<vmem>>, %arg9: memref<1x128x128xbf16, #tpu.memory_space<vmem>>, %arg10: memref<1x128x128xbf16, #tpu.memory_space<vmem>>) attributes {dimension_semantics = [#tpu.dimension_semantics<parallel>, #tpu.dimension_semantics<parallel>], iteration_bounds = array<i64: 2, 1>, scalar_prefetch = 0 : i64, scratch_operands = 0 : i64, tpu.core_type = #tpu.core_type<tc>, window_params = [{transform_indices = @transform_0, window_bounds = array<i64: 1, 128, 128>}, {transform_indices = @transform_1, window_bounds = array<i64: 1, 128, 128>}, {transform_indices = @transform_2, window_bounds = array<i64: 1, 128, 128>}, {pipeline_mode = #tpu.pipeline_mode<synchronous>, transform_indices = @transform_3, window_bounds = array<i64: 128, 128>}, {pipeline_mode = #tpu.pipeline_mode<synchronous>, transform_indices = @transform_4, window_bounds = array<i64: 128, 128>}, {pipeline_mode = #tpu.pipeline_mode<synchronous>, transform_indices = @transform_5, window_bounds = array<i64: 128, 128>}, {transform_indices = @transform_6, window_bounds = array<i64: 1, 128, 128>}, {transform_indices = @transform_7, window_bounds = array<i64: 1, 128, 128>}, {transform_indices = @transform_8, window_bounds = array<i64: 1, 128, 128>}]} {
    %c0 = arith.constant 0 : index
    %c0_0 = arith.constant 0 : index
    %c0_1 = arith.constant 0 : index
    %0 = vector.load %arg2[%c0, %c0_0, %c0_1] : memref<1x128x128xbf16, #tpu.memory_space<vmem>>, vector<1x128x128xbf16>
    %1 = vector.shape_cast %0 : vector<1x128x128xbf16> to vector<128x128xbf16>
    %c0_2 = arith.constant 0 : index
    %c0_3 = arith.constant 0 : index
    %2 = vector.load %arg5[%c0_2, %c0_3] : memref<128x128xbf16, #tpu.memory_space<vmem>>, vector<128x128xbf16>
    %cst = arith.constant dense<0.000000e+00> : vector<128x128xf32>
    %3 = tpu.matmul %1, %2, %cst {dimension_numbers = #tpu.dot_dimension_numbers<[1], [0], [0], [1], [0, 0, 1, 1], [], []>} : vector<128x128xbf16>, vector<128x128xbf16>, vector<128x128xf32> -> vector<128x128xf32>
    %cst_4 = arith.constant 0.176776692 : f32
    %4 = vector.broadcast %cst_4 : f32 to vector<128x128xf32>
    %5 = arith.mulf %3, %4 : vector<128x128xf32>
    %6 = arith.truncf %5 : vector<128x128xf32> to vector<128x128xbf16>
    %c0_5 = arith.constant 0 : index
    %c0_6 = arith.constant 0 : index
    %c0_7 = arith.constant 0 : index
    %7 = vector.load %arg8[%c0_5, %c0_6, %c0_7] : memref<1x128x128xbf16, #tpu.memory_space<vmem>>, vector<1x128x128xbf16>
    %8 = vector.shape_cast %7 : vector<1x128x128xbf16> to vector<128x128xbf16>
    %9 = vector.shape_cast %6 : vector<128x128xbf16> to vector<1x128x128xbf16>
    tpu.vector_store %arg8[%c0_5, %c0_6, %c0_7], %9 {strides = array<i32>} : memref<1x128x128xbf16, #tpu.memory_space<vmem>>, vector<1x128x128xbf16>,
    %c0_8 = arith.constant 0 : index
    %c0_9 = arith.constant 0 : index
    %c0_10 = arith.constant 0 : index
    %10 = vector.load %arg3[%c0_8, %c0_9, %c0_10] : memref<1x128x128xbf16, #tpu.memory_space<vmem>>, vector<1x128x128xbf16>
    %11 = vector.shape_cast %10 : vector<1x128x128xbf16> to vector<128x128xbf16>
    %c0_11 = arith.constant 0 : index
    %c0_12 = arith.constant 0 : index
    %12 = vector.load %arg6[%c0_11, %c0_12] : memref<128x128xbf16, #tpu.memory_space<vmem>>, vector<128x128xbf16>
    %cst_13 = arith.constant dense<0.000000e+00> : vector<128x128xf32>
    %13 = tpu.matmul %11, %12, %cst_13 {dimension_numbers = #tpu.dot_dimension_numbers<[1], [0], [0], [1], [0, 0, 1, 1], [], []>} : vector<128x128xbf16>, vector<128x128xbf16>, vector<128x128xf32> -> vector<128x128xf32>
    %14 = arith.truncf %13 : vector<128x128xf32> to vector<128x128xbf16>
    %c0_14 = arith.constant 0 : index
    %c0_15 = arith.constant 0 : index
    %c0_16 = arith.constant 0 : index
    %15 = vector.load %arg9[%c0_14, %c0_15, %c0_16] : memref<1x128x128xbf16, #tpu.memory_space<vmem>>, vector<1x128x128xbf16>
    %16 = vector.shape_cast %15 : vector<1x128x128xbf16> to vector<128x128xbf16>
    %17 = vector.shape_cast %14 : vector<128x128xbf16> to vector<1x128x128xbf16>
    tpu.vector_store %arg9[%c0_14, %c0_15, %c0_16], %17 {strides = array<i32>} : memref<1x128x128xbf16, #tpu.memory_space<vmem>>, vector<1x128x128xbf16>,
    %c0_17 = arith.constant 0 : index
    %c0_18 = arith.constant 0 : index
    %c0_19 = arith.constant 0 : index
    %18 = vector.load %arg4[%c0_17, %c0_18, %c0_19] : memref<1x128x128xbf16, #tpu.memory_space<vmem>>, vector<1x128x128xbf16>
    %19 = vector.shape_cast %18 : vector<1x128x128xbf16> to vector<128x128xbf16>
    %c0_20 = arith.constant 0 : index
    %c0_21 = arith.constant 0 : index
    %20 = vector.load %arg7[%c0_20, %c0_21] : memref<128x128xbf16, #tpu.memory_space<vmem>>, vector<128x128xbf16>
    %cst_22 = arith.constant dense<0.000000e+00> : vector<128x128xf32>
    %21 = tpu.matmul %19, %20, %cst_22 {dimension_numbers = #tpu.dot_dimension_numbers<[1], [0], [0], [1], [0, 0, 1, 1], [], []>} : vector<128x128xbf16>, vector<128x128xbf16>, vector<128x128xf32> -> vector<128x128xf32>
    %22 = arith.truncf %21 : vector<128x128xf32> to vector<128x128xbf16>
    %c0_23 = arith.constant 0 : index
    %c0_24 = arith.constant 0 : index
    %c0_25 = arith.constant 0 : index
    %23 = vector.load %arg10[%c0_23, %c0_24, %c0_25] : memref<1x128x128xbf16, #tpu.memory_space<vmem>>, vector<1x128x128xbf16>
    %24 = vector.shape_cast %23 : vector<1x128x128xbf16> to vector<128x128xbf16>
    %25 = vector.shape_cast %22 : vector<128x128xbf16> to vector<1x128x128xbf16>
    tpu.vector_store %arg10[%c0_23, %c0_24, %c0_25], %25 {strides = array<i32>} : memref<1x128x128xbf16, #tpu.memory_space<vmem>>, vector<1x128x128xbf16>,
    return
  }
  func.func @transform_0(%arg0: i32, %arg1: i32) -> (i32, i32, i32) {
    %c0_i32 = arith.constant 0 : i32
    %c0_i32_0 = arith.constant 0 : i32
    return %arg0, %arg1, %c0_i32 : i32, i32, i32
  }
  func.func @transform_1(%arg0: i32, %arg1: i32) -> (i32, i32, i32) {
    %c0_i32 = arith.constant 0 : i32
    %c0_i32_0 = arith.constant 0 : i32
    return %arg0, %arg1, %c0_i32 : i32, i32, i32
  }
  func.func @transform_2(%arg0: i32, %arg1: i32) -> (i32, i32, i32) {
    %c0_i32 = arith.constant 0 : i32
    %c0_i32_0 = arith.constant 0 : i32
    return %arg0, %arg1, %c0_i32 : i32, i32, i32
  }
  func.func @transform_3(%arg0: i32, %arg1: i32) -> (i32, i32) {
    %c0_i32 = arith.constant 0 : i32
    %c0_i32_0 = arith.constant 0 : i32
    %c0_i32_1 = arith.constant 0 : i32
    return %c0_i32, %c0_i32_0 : i32, i32
  }
  func.func @transform_4(%arg0: i32, %arg1: i32) -> (i32, i32) {
    %c0_i32 = arith.constant 0 : i32
    %c0_i32_0 = arith.constant 0 : i32
    %c0_i32_1 = arith.constant 0 : i32
    return %c0_i32, %c0_i32_0 : i32, i32
  }
  func.func @transform_5(%arg0: i32, %arg1: i32) -> (i32, i32) {
    %c0_i32 = arith.constant 0 : i32
    %c0_i32_0 = arith.constant 0 : i32
    %c0_i32_1 = arith.constant 0 : i32
    return %c0_i32, %c0_i32_0 : i32, i32
  }
  func.func @transform_6(%arg0: i32, %arg1: i32) -> (i32, i32, i32) {
    %c0_i32 = arith.constant 0 : i32
    %c0_i32_0 = arith.constant 0 : i32
    return %arg0, %arg1, %c0_i32 : i32, i32, i32
  }
  func.func @transform_7(%arg0: i32, %arg1: i32) -> (i32, i32, i32) {
    %c0_i32 = arith.constant 0 : i32
    %c0_i32_0 = arith.constant 0 : i32
    return %arg0, %arg1, %c0_i32 : i32, i32, i32
  }
  func.func @transform_8(%arg0: i32, %arg1: i32) -> (i32, i32, i32) {
    %c0_i32 = arith.constant 0 : i32
    %c0_i32_0 = arith.constant 0 : i32
    return %arg0, %arg1, %c0_i32 : i32, i32, i32
  }
}

</mosaic_0001>

<bundles_post_ra>
// kernel: tpu_custom_call.1
= control target key start
LH: loop header
LB: loop body
LE: loop exit
PB: predicated region body
PF: predicated region fallthrough
CT: control target
= control target key end

     0   :  { %s2787_s0 = inlined_call_operand.hbm [shape: bf16[2,128,128], index: 0, kind: input, shape index: {}]   ;;  %s2788_s1 = inlined_call_operand.hbm [shape: bf16[2,128,128], index: 1, kind: input, shape index: {}]   ;;  %s2789_s2 = inlined_call_operand.hbm [shape: bf16[2,128,128], index: 2, kind: input, shape index: {}]   ;;  %s2790_s3 = inlined_call_operand.hbm [shape: bf16[128,128], index: 3, kind: input, shape index: {}]   ;;  %s2791_s4 = inlined_call_operand.hbm [shape: bf16[128,128], index: 4, kind: input, shape index: {}]   ;;  %s2792_s5 = inlined_call_operand.hbm [shape: bf16[128,128], index: 5, kind: input, shape index: {}]   ;;  %s2793_s6 = inlined_call_operand.hbm [shape: bf16[2,128,128], index: 6, kind: output, shape index: {0}]   ;;  %s2794_s7 = inlined_call_operand.hbm [shape: bf16[2,128,128], index: 7, kind: output, shape index: {1}]   ;;  %s2795_s8 = inlined_call_operand.hbm [shape: bf16[2,128,128], index: 8, kind: output, shape index: {2}]  }
   0x1   :  { %2808 = sst [smem:[#allocation29_spill]] %s2788_s1 }
   0x2   :  { %2809 = sst [smem:[#allocation30_spill]] %s2790_s3 }
   0x3   :  { %2810 = sst [smem:[#allocation31_spill]] %s2791_s4 }
   0x4   :  { %2811 = sst [smem:[#allocation32_spill]] %s2792_s5 }
   0x5   :  { %14 = vsyncpa [#allocation3], 0 }
   0x6   :  { %16 = vsyncpa [#allocation3 + $0x1], 0 }
   0x7   :  { %17 = vsyncpa [#allocation6], 0 }
   0x8   :  { %19 = vsyncpa [#allocation6 + $0x1], 0 }
   0x9   :  { %20 = vsyncpa [#allocation9], 0 }
   0xa   :  { %21 = vsyncpa [#allocation12], 0 }
   0xb   :  { %22 = vsyncpa [#allocation4], 0 }
   0xc   :  { %24 = vsyncpa [#allocation4 + $0x1], 0 }
   0xd   :  { %25 = vsyncpa [#allocation15], 0 }
   0xe   :  { %27 = vsyncpa [#allocation15 + $0x1], 0  ;;  %s2407_s27 = smov 0   ;;  %s2409_s28 = smov 0  }
   0xf   :  { %s2411_s29 = smov 0   ;;  %s2413_s30 = smov 0  }
  0x10   :  { %s2415_s9 = smov 0   ;;  %s2417_s10 = smov 0  }
  0x11 LB: > { %2812 = sst [smem:[#allocation23_spill]] %s2333_s27  ;;  %s2438_s11 = sadd.s32 4294967295, %s2353_s10   ;;  %s2353_s10 = sphi %s2417_s10, %s33_s10   ;;  %s2349_s9 = sphi %s2415_s9, %s2841_s9   ;;  %s2345_s30 = sphi %s2413_s30, %s2836_s30   ;;  %s2341_s29 = sphi %s2411_s29, %s2840_s29   ;;  %s2337_s28 = sphi %s2409_s28, %s2839_s28   ;;  %s2333_s27 = sphi %s2407_s27, %s2838_s27  }
  0x12   : > { %2813 = sst [smem:[#allocation24_spill]] %s2349_s9  ;;  %s2796_s12 = sadd.s32 4294967294, %s2353_s10  }
  0x13   : > { %2814 = sst [smem:[#allocation25_spill]] %s2353_s10  ;;  %p67_p0 = scmp.ne.s32.totalorder %s2337_s28, %s2333_s27 }
  0x14   : > { %p68_p1 = scmp.eq.s32.totalorder %s2438_s11, 0  ;;  %p212_p2 = scmp.eq.s32.totalorder %s2438_s11, 1 }
  0x15   : > { %p218_p3 = scmp.eq.s32.totalorder %s2796_s12, 1  ;;  %p1456_p5 = scmp.ge.s32.totalorder %s2353_s10, 1 }
  0x16   : > { %p2449_p4 = por %p68_p1, %p67_p0  ;;  %p281_p7 = scmp.lt.s32.totalorder %s2353_s10, 3 }
  0x17   : > { %p2454_p6 = por %p218_p3, %p67_p0  ;;  %s2818_s3 = sld [smem:[#allocation30_spill]] }
  0x18   : > { %p2462_p8 = pnand %p1456_p5, %p281_p7  ;;  %s2355_s19 = smov [#allocation8]  }
  0x19   : > { %s2816_s14 = scalar_select %p2454_p6, 1, 0 }
  0x1a   : > { %p1926_p9 = pneg %p2462_p8  ;;  %s294_s20 = sshll.u32 %s2355_s19, 4  ;;  %s295_s20 = int_to_ptr.vmem [resolvable:$true] %s294_s20 }
  0x1b   : > { %2817 = sst [smem:[#allocation26_spill]] %s2816_s14  ;;  %p1460_p11 = scmp.ge.s32.totalorder %s2353_s10, 2 }
  0x1c   : > { %p2470_p10 = pnand %p1926_p9, %p68_p1  ;;  %s2797_s22 = smov 64  }
  0x1d   : > { %s292_s17 = sshll.u32 %s2818_s3, 4  ;;  %s2799_s23 = smov 4   ;;  %s293_s17 = int_to_ptr.hbm [resolvable:$true] %s292_s17 }
  0x1e   : > { %1929 = dma.hbm_to_vmem [thread:$0]  (!%p2470_p10), %s293_s17, 1024, %s295_s20, [#allocation9], %s2797_s22, %s2797_s22, %s2799_s23  }
  0x1f   : > { %s45_s24 = sadd.s32 1, %s2349_s9  ;;  %s54_s25 = sadd.s32 1, %s2341_s29 }
  0x20   : > { %p47_p12 = scmp.ge.s32.totalorder %s45_s24, 2  ;;  %p61_p13 = scmp.ne.s32.totalorder %s2341_s29, %s2337_s28 }
  0x21   : > { %p62_p0 = scmp.eq.s32.totalorder %s2353_s10, 0  ;;  %p1959_p7 = scmp.lt.s32.totalorder %s2353_s10, 2 }
  0x22   : > { %s2843_s24 = smov (%p47_p12, %s45_s24), 0  ;;  %p2489_p5 = por %p212_p2, %p61_p13 }
  0x23   : > { %2821 = sst [smem:[#allocation27_spill]] %s2843_s24  ;;  %p63_p3 = por %p62_p0, %p61_p13 }
  0x24   : > { %s49_s15 = ssub.s32 %s2349_s9, %s2843_s24  ;;  %s2802_s16 = sand.u32 1, %s2341_s29  }
  0x25   : > { %p52_p9 = scmp.eq.s32.totalorder %s49_s15, 0  ;;  %s2499_s17 = sshll.u32 %s2802_s16, 6 }
  0x26   : > { %s2502_s19 = sshll.u32 %s2349_s9, 6  ;;  %p2507_p12 = pnand %p1959_p7, %p63_p3 }
  0x27   : > { %s2505_s20 = scalar_select %p52_p9, %s2341_s29, %s54_s25  }
  0x28   : > { %s360_s22 = sand.u32 1, %s2353_s10   ;;  %s2825_s1 = sld [smem:[#allocation29_spill]] }
  0x29   : > { %2823 = sst [smem:[#allocation28_spill]] %s2505_s20  ;;  %s364_s16 = scalar_lea.vmem [#allocation5], %s2499_s17 }
  0x2a   : > { %s374_s14 = sshll.u32 %s364_s16, 4  ;;  %s2517_s25 = scalar_lea.sflag [#allocation6], %s360_s22  ;;  %s375_s14 = int_to_ptr.vmem [resolvable:$true] %s374_s14 }
  0x2b   : > { %s2826_s9 = smov 4   ;;  %s2827_s20 = smov 64  }
  0x2c   : > { %s2828_s4 = sld [smem:[#allocation31_spill]]  ;;  %s2358_s23 = smov [#allocation10]  }
  0x2d   : > { %s308_s16 = sshll.u32 %s2358_s23, 4  ;;  %s2829_s5 = sld [smem:[#allocation32_spill]]  ;;  %s309_s16 = int_to_ptr.vmem [resolvable:$true] %s308_s16 }
  0x2e   : > { %s371_s15 = scalar_lea.hbm %s2825_s1, %s2502_s19  ;;  %s2359_s27 = smov [#allocation11]  }
  0x2f   : > { %s372_s24 = sshll.u32 %s371_s15, 4  ;;  %s322_s10 = sshll.u32 %s2359_s27, 4  ;;  %s373_s24 = int_to_ptr.hbm [resolvable:$true] %s372_s24  ;;  %s323_s10 = int_to_ptr.vmem [resolvable:$true] %s322_s10 }
  0x30   : > { %1942 = dma.hbm_to_vmem [thread:$0]  (!%p2507_p12), %s373_s24, 1024, %s375_s14, %s2517_s25, %s2827_s20, %s2827_s20, %s2826_s9  }
  0x31   : > { %s347_s24 = scalar_lea.hbm %s2787_s0, %s2502_s19  ;;  %s340_s23 = scalar_lea.vmem [#allocation2], %s2499_s17 }
  0x32   : > { %s306_s3 = sshll.u32 %s2828_s4, 4  ;;  %s350_s15 = sshll.u32 %s340_s23, 4  ;;  %s307_s3 = int_to_ptr.hbm [resolvable:$true] %s306_s3  ;;  %s351_s15 = int_to_ptr.vmem [resolvable:$true] %s350_s15 }
  0x33   : > { %s320_s22 = sshll.u32 %s2829_s5, 4  ;;  %s348_s4 = sshll.u32 %s347_s24, 4  ;;  %s321_s22 = int_to_ptr.hbm [resolvable:$true] %s320_s22  ;;  %s349_s4 = int_to_ptr.hbm [resolvable:$true] %s348_s4 }
  0x34   : > { %1932 = dma.hbm_to_vmem [thread:$0]  (!%p2470_p10), %s307_s3, 1024, %s309_s16, [#allocation9], %s2827_s20, %s2827_s20, %s2826_s9  }
  0x35   : > { %1935 = dma.hbm_to_vmem [thread:$0]  (!%p2470_p10), %s321_s22, 1024, %s323_s10, [#allocation12], %s2827_s20, %s2827_s20, %s2826_s9  }
  0x36   : > { %s2830_s3 = sand.u32 1, %s2341_s29   ;;  %s395_s22 = scalar_lea.hbm %s2789_s2, %s2502_s19 }
  0x37   : > { %s337_s16 = scalar_lea.sflag [#allocation3], %s2830_s3  ;;  %s388_s10 = scalar_lea.vmem [#allocation7], %s2499_s17 }
  0x38   : > { %1939 = dma.hbm_to_vmem [thread:$0]  (!%p2507_p12), %s349_s4, 1024, %s351_s15, %s337_s16, %s2827_s20, %s2827_s20, %s2826_s9  }
  0x39   : > { %s398_s5 = sshll.u32 %s388_s10, 4  ;;  %s396_s1 = sshll.u32 %s395_s22, 4  ;;  %s399_s5 = int_to_ptr.vmem [resolvable:$true] %s398_s5  ;;  %s397_s1 = int_to_ptr.hbm [resolvable:$true] %s396_s1 }
  0x3a   : > { %1945 = dma.hbm_to_vmem [thread:$0]  (!%p2507_p12), %s397_s1, 1024, %s399_s5, %s2517_s25, %s2827_s20, %s2827_s20, %s2826_s9  }
  0x3b   : > { %410 = sbr.rel (%p2462_p8) target bundleno = 355 (0x163), region = 44  ;;  %s2567_s4 = sand.u32 (!%p2462_p8), 1, %s2337_s28  }
  0x3c   : > { %s2570_s19 = sshll.u32 (!%p2462_p8), %s2567_s4, 6  ;;  %s413_s17 = scalar_lea.sflag (!%p2462_p8), [#allocation3], %s2567_s4 }
  0x3d   : > { %s2574_s14 = scalar_lea.vmem (!%p2462_p8), [#allocation2], %s2570_s19 }
  0x40   : > { %2308 = dma.done.wait (%p2449_p4), %s413_s17, 1024  }
  0x41   : > { %2310 = vsyncadd (%p2449_p4), %s413_s17, 4294966272  ;;  %s422_s5 = sand.u32 1, %s2438_s11   ;;  %s2584_s12 = scalar_lea.vmem [#allocation5], %s2570_s19 }
  0x42   : > { %s423_s9 = scalar_lea.sflag [#allocation6], %s422_s5 }
  0x43   : > { %2312 = dma.done.wait (%p2449_p4), %s423_s9, 2048  }
  0x44   : > { %2314 = vsyncadd (%p2449_p4), %s423_s9, 4294965248  ;;  %s2591_s18 = scalar_lea.vmem [#allocation7], %s2570_s19 }
  0x45   : > { %2316 = dma.done.wait (%p68_p1), [#allocation9], 2048  }
  0x46   : > { %2318 = vsyncadd (%p68_p1), [#allocation9], 4294965248 }
  0x47   : > { %2320 = dma.done.wait (%p68_p1), [#allocation12], 1024  }
  0x48   : > { %2322 = vsyncadd (%p68_p1), [#allocation12], 4294966272  ;;  %v1701_v0 = vld [vmem:[#allocation8 + $0x38] sm:$0xff]  ;;  %v1700_v3 = vld [vmem:[#allocation8 + $0x30] sm:$0xff]  ;;  %s2650_s13 = scalar_lea.vmem [#allocation14], %s2570_s19  ;;  %s2654_s20 = scalar_lea.vmem [#allocation13], %s2570_s19 }
  0x49   : > { %v1717_v1 = vld [vmem:[#allocation10 + $0x38] sm:$0xff]  ;;  %639 = vmatpush.bf16.msra.mxu0 %v1701_v0  ;;  %1878 = vmatpush.bf16.msra.mxu3 %v1701_v0  ;;  %v1716_v4 = vld [vmem:[#allocation10 + $0x30] sm:$0xff]  ;;  %v1699_v6 = vld [vmem:[#allocation8 + $0x28] sm:$0xff]  ;;  %s2658_s25 = scalar_lea.vmem [#allocation16], %s2570_s19  ;;  %s1734_s24 = sshll.u32 %s2345_s30, 6 }
  0x4a   : > { %v2601_v2 = vld [vmem:[#allocation11 + $0x38] sm:$0xff]  ;;  %864 = vmatpush.bf16.msra.mxu1 %v1717_v1  ;;  %v2604_v5 = vld [vmem:[#allocation11 + $0x30] sm:$0xff]  ;;  %v1715_v7 = vld [vmem:[#allocation10 + $0x28] sm:$0xff]  ;;  %s1179_s23 = sshll.u32 %s2654_s20, 4  ;;  %s1198_s15 = sshll.u32 %s2650_s13, 4  ;;  %s2687_s23 = int_to_ptr.vmem [resolvable:$true] %s1179_s23  ;;  %s2689_s15 = int_to_ptr.vmem [resolvable:$true] %s1198_s15 }
  0x4b   : > { %1073 = vmatpush.bf16.msra.mxu2 %v2601_v2  ;;  %v2607_v8 = vld [vmem:[#allocation11 + $0x28] sm:$0xff]  ;;  %v1698_v9 = vld [vmem:[#allocation8 + $0x20] sm:$0xff]  ;;  %v1697_v12 = vld [vmem:[#allocation8 + $0x18] sm:$0xff]  ;;  %s1197_s21 = scalar_lea.hbm %s2794_s7, %s1734_s24  ;;  %s1178_s10 = scalar_lea.hbm %s2793_s6, %s1734_s24 }
  0x4c   : > { %v1714_v10 = vld [vmem:[#allocation10 + $0x20] sm:$0xff]  ;;  %v1713_v13 = vld [vmem:[#allocation10 + $0x18] sm:$0xff]  ;;  %v1696_v15 = vld [vmem:[#allocation8 + $0x10] sm:$0xff]  ;;  %s2691_s30 = sshll.u32 %s1197_s21, 4  ;;  %s1216_s17 = scalar_lea.hbm %s2795_s8, %s1734_s24  ;;  %s1201_s30 = int_to_ptr.hbm [resolvable:$true] %s2691_s30 }
  0x4d   : > { %640 = vmatpush.bf16.msra.mxu0 %v1700_v3  ;;  %1879 = vmatpush.bf16.msra.mxu3 %v1700_v3  ;;  %v2610_v11 = vld [vmem:[#allocation11 + $0x20] sm:$0xff]  ;;  %v2613_v14 = vld [vmem:[#allocation11 + $0x18] sm:$0xff]  ;;  %v1712_v16 = vld [vmem:[#allocation10 + $0x10] sm:$0xff]  ;;  %s1217_s9 = sshll.u32 %s2658_s25, 4  ;;  %s2213_s3 = sshra.s32 %s1201_s30, 4  ;;  %s2214_s3 = int_to_ptr.hbm [resolvable:$true] %s2213_s3  ;;  %s1218_s9 = int_to_ptr.vmem [resolvable:$true] %s1217_s9 }
  0x4e   : > { %865 = vmatpush.bf16.msra.mxu1 %v1716_v4  ;;  %v2616_v17 = vld [vmem:[#allocation11 + $0x10] sm:$0xff]  ;;  %v1695_v18 = vld [vmem:[#allocation8 + $0x8] sm:$0xff]  ;;  %v1694_v21 = vld [vmem:[#allocation8] sm:$0xff]  ;;  %s2215_s24 = scalar_lea.hbm %s2214_s3, 64  ;;  %p2220_p8 = scmp.lt.s32.totalorder %s2214_s3, %s2794_s7 }
  0x4f   : > { %1074 = vmatpush.bf16.msra.mxu2 %v2604_v5  ;;  %v1711_v19 = vld [vmem:[#allocation10 + $0x8] sm:$0xff]  ;;  %v1710_v22 = vld [vmem:[#allocation10] sm:$0xff]  ;;  %v1692_v25 = vld [vmem:[%s2574_s14 + $0x30] sm:$0xff]  ;;  %p2216_p1 = scmp.ne.s32.totalorder %s2214_s3, %s2215_s24 }
  0x50   : > { %v1727_v20 = vld [vmem:[#allocation11 + $0x8] sm:$0xff]  ;;  %v1726_v23 = vld [vmem:[#allocation11] sm:$0xff]  ;;  %v1693_v29 = vld [vmem:[%s2574_s14 + $0x38] sm:$0xff] }
  0x51   : > { %641 = vmatpush.bf16.msra.mxu0 %v1699_v6  ;;  %1880 = vmatpush.bf16.msra.mxu3 %v1699_v6  ;;  %v1686_v24 = vld [vmem:[%s2574_s14] sm:$0xff]  ;;  %v1687_v28 = vld [vmem:[%s2574_s14 + $0x8] sm:$0xff]  ;;  %v1688_v32 = vld [vmem:[%s2574_s14 + $0x10] sm:$0xff]  ;;  %p2217_p2 = pnand %p2216_p1, %p2489_p5 }
  0x52   : > { %866 = vmatpush.bf16.msra.mxu1 %v1715_v7  ;;  %v1702_v26 = vld [vmem:[%s2584_s12] sm:$0xff]  ;;  %v1703_v30 = vld [vmem:[%s2584_s12 + $0x8] sm:$0xff]  ;;  %v1708_v33 = vld [vmem:[%s2584_s12 + $0x30] sm:$0xff] }
  0x53   : > { %1075 = vmatpush.bf16.msra.mxu2 %v2607_v8  ;;  %v1718_v27 = vld [vmem:[%s2591_s18] sm:$0xff]  ;;  %v1719_v31 = vld [vmem:[%s2591_s18 + $0x8] sm:$0xff]  ;;  %v1704_v34 = vld [vmem:[%s2584_s12 + $0x10] sm:$0xff]  ;;  %p2218_p4 = pneg %p2217_p2 }
  0x54   : > { %v1720_v35 = vld [vmem:[%s2591_s18 + $0x10] sm:$0xff]  ;;  %v1689_v36 = vld [vmem:[%s2574_s14 + $0x18] sm:$0xff]  ;;  %v1690_v40 = vld [vmem:[%s2574_s14 + $0x20] sm:$0xff] }
  0x55   : > { %642 = vmatpush.bf16.msra.mxu0 %v1698_v9  ;;  %1881 = vmatpush.bf16.msra.mxu3 %v1698_v9  ;;  %v1709_v37 = vld [vmem:[%s2584_s12 + $0x38] sm:$0xff]  ;;  %v1724_v41 = vld [vmem:[%s2591_s18 + $0x30] sm:$0xff]  ;;  %v1706_v42 = vld [vmem:[%s2584_s12 + $0x20] sm:$0xff] }
  0x56   : > { %867 = vmatpush.bf16.msra.mxu1 %v1714_v10  ;;  %v1705_v38 = vld [vmem:[%s2584_s12 + $0x18] sm:$0xff]  ;;  %v1722_v43 = vld [vmem:[%s2591_s18 + $0x20] sm:$0xff]  ;;  %v1691_v44 = vld [vmem:[%s2574_s14 + $0x28] sm:$0xff]  ;;  %s2696_s14 = sshll.u32 %s1178_s10, 4  ;;  %s1182_s14 = int_to_ptr.hbm [resolvable:$true] %s2696_s14 }
  0x57   : > { %1076 = vmatpush.bf16.msra.mxu2 %v2610_v11  ;;  %v1721_v39 = vld [vmem:[%s2591_s18 + $0x18] sm:$0xff]  ;;  %v1707_v46 = vld [vmem:[%s2584_s12 + $0x28] sm:$0xff]  ;;  %s2703_s12 = sshll.u32 %s1216_s17, 4  ;;  %s1220_s12 = int_to_ptr.hbm [resolvable:$true] %s2703_s12 }
  0x58   : > { %v1725_v45 = vld [vmem:[%s2591_s18 + $0x38] sm:$0xff]  ;;  %v1723_v47 = vld [vmem:[%s2591_s18 + $0x28] sm:$0xff]  ;;  %s2707_s18 = scalar_lea.sflag [#allocation15], %s422_s5 }
  0x59   : > { %643 = vmatpush.bf16.msra.mxu0 %v1697_v12  ;;  %1882 = vmatpush.bf16.msra.mxu3 %v1697_v12 }
  0x5a   : > { %868 = vmatpush.bf16.msra.mxu1 %v1713_v13 }
  0x5b   : > { %1077 = vmatpush.bf16.msra.mxu2 %v2613_v14 }
  0x5d   : > { %644 = vmatpush.bf16.msra.mxu0 %v1696_v15  ;;  %1883 = vmatpush.bf16.msra.mxu3 %v1696_v15 }
  0x5e   : > { %869 = vmatpush.bf16.msra.mxu1 %v1712_v16 }
  0x5f   : > { %1078 = vmatpush.bf16.msra.mxu2 %v2616_v17 }
  0x61   : > { %645 = vmatpush.bf16.msra.mxu0 %v1695_v18  ;;  %1884 = vmatpush.bf16.msra.mxu3 %v1695_v18 }
  0x62   : > { %870 = vmatpush.bf16.msra.mxu1 %v1711_v19 }
  0x63   : > { %1079 = vmatpush.bf16.msra.mxu2 %v1727_v20 }
  0x65   : > { %646 = vmatpush.bf16.msra.mxu0 %v1694_v21  ;;  %1885 = vmatpush.bf16.msra.mxu3 %v1694_v21 }
  0x66   : > { %871 = vmatpush.bf16.msra.mxu1 %v1710_v22 }
  0x67   : > { %1080 = vmatpush.bf16.msra.mxu2 %v1726_v23 }
  0x68   : > { %647 = vmatmul.bf16.vlgmr.msra.gmra.mxu0 %v1686_v24  ;;  %677 = vmatmul.bf16.vlgmr.msra.gmra.mxu3 %v1692_v25 }
  0x69   : > { %1886 = vmatpush.bf16.msrb.mxu3 %v1717_v1  ;;  %872 = vmatmul.bf16.vlgmr.msra.gmra.mxu1 %v1702_v26 }
  0x6a   : > { %1081 = vmatmul.bf16.vlgmr.msra.gmra.mxu2 %v1718_v27 }
  0x6d   : > { %1887 = vmatpush.bf16.msrb.mxu3 %v1716_v4 }
  0x71   : > { %1888 = vmatpush.bf16.msrb.mxu3 %v1715_v7 }
  0x75   : > { %1889 = vmatpush.bf16.msrb.mxu3 %v1714_v10 }
  0x78   : > { %652 = vmatmul.bf16.gmra.mxu0 %v1687_v28  ;;  %682 = vmatmul.bf16.gmra.mxu3 %v1693_v29 }
  0x79   : > { %1890 = vmatpush.bf16.msrb.mxu3 %v1713_v13  ;;  %877 = vmatmul.bf16.gmra.mxu1 %v1703_v30 }
  0x7a   : > { %1086 = vmatmul.bf16.gmra.mxu2 %v1719_v31 }
  0x7d   : > { %1891 = vmatpush.bf16.msrb.mxu3 %v1712_v16 }
  0x81   : > { %1892 = vmatpush.bf16.msrb.mxu3 %v1711_v19 }
  0x85   : > { %1893 = vmatpush.bf16.msrb.mxu3 %v1710_v22 }
  0x88   : > { %657 = vmatmul.bf16.gmra.mxu0 %v1688_v32  ;;  %902 = vmatmul.bf16.vlgmr.msrb.gmra.mxu3 %v1708_v33 }
  0x89   : > { %1894 = vmatpush.bf16.msra.mxu3 %v2601_v2  ;;  %882 = vmatmul.bf16.gmra.mxu1 %v1704_v34 }
  0x8a   : > { %1091 = vmatmul.bf16.gmra.mxu2 %v1720_v35 }
  0x8d   : > { %1895 = vmatpush.bf16.msra.mxu3 %v2604_v5 }
  0x91   : > { %1896 = vmatpush.bf16.msra.mxu3 %v2607_v8 }
  0x95   : > { %1897 = vmatpush.bf16.msra.mxu3 %v2610_v11 }
  0x98   : > { %662 = vmatmul.bf16.gmra.mxu0 %v1689_v36  ;;  %907 = vmatmul.bf16.gmra.mxu3 %v1709_v37 }
  0x99   : > { %1898 = vmatpush.bf16.msra.mxu3 %v2613_v14  ;;  %887 = vmatmul.bf16.gmra.mxu1 %v1705_v38 }
  0x9a   : > { %1096 = vmatmul.bf16.gmra.mxu2 %v1721_v39 }
  0x9d   : > { %1899 = vmatpush.bf16.msra.mxu3 %v2616_v17 }
  0xa1   : > { %1900 = vmatpush.bf16.msra.mxu3 %v1727_v20 }
  0xa5   : > { %1901 = vmatpush.bf16.msra.mxu3 %v1726_v23 }
  0xa8   : > { %667 = vmatmul.bf16.gmra.mxu0 %v1690_v40  ;;  %1111 = vmatmul.bf16.vlgmr.msra.gmra.mxu3 %v1724_v41 }
  0xa9   : > { %892 = vmatmul.bf16.gmra.mxu1 %v1706_v42 }
  0xaa   : > { %1101 = vmatmul.bf16.gmra.mxu2 %v1722_v43 }
  0xb8   : > { %672 = vmatmul.bf16.gmra.mxu0 %v1691_v44  ;;  %1116 = vmatmul.bf16.gmra.mxu3 %v1725_v45 }
  0xb9   : > { %897 = vmatmul.bf16.gmra.mxu1 %v1707_v46 }
  0xba   : > { %1106 = vmatmul.bf16.gmra.mxu2 %v1723_v47 }
  0xe5   : > { %v648_v48 = vpop.f32.mrf.mxu0 }
  0xe6   : > { %v873_v49 = vpop.f32.mrf.mxu1  ;;  %v688_v53 = vmul.f32 0.17677669, %v648_v48 }
  0xeb   : > { %v678_v50 = vpop.f32.mrf.mxu3 }
  0xec   : > { %v700_v59 = vmul.f32 0.17677669, %v678_v50 }
  0xed   : > { %v1082_v51 = vpop.f32.mrf.mxu2  ;;  %v650_v52 = vpop.f32.mrf.mxu0 }
  0xee   : > { %v689_v54 = vmul.f32 0.17677669, %v650_v52  ;;  %v875_v55 = vpop.f32.mrf.mxu1 }
  0xef   : > { %v1780_v56 = vpack.c.bf16 %v875_v55, %v873_v49 }
  0xf0   : > { %v1740_v57 = vpack.c.bf16 %v689_v54, %v688_v53 }
  0xf1   : > { %1781 = vst [vmem:[%s2650_s13] sm:$0xff] %v1780_v56  }
  0xf2   : > { %1741 = vst [vmem:[%s2654_s20] sm:$0xff] %v1740_v57  }
  0xf3   : > { %v680_v58 = vpop.f32.mrf.mxu3 }
  0xf4   : > { %v701_v60 = vmul.f32 0.17677669, %v680_v58 }
  0xf5   : > { %v1084_v61 = vpop.f32.mrf.mxu2  ;;  %v653_v63 = vpop.f32.mrf.mxu0 }
  0xf6   : > { %v1820_v62 = vpack.c.bf16 %v1084_v61, %v1082_v51  ;;  %v1770_v0 = vpack.c.bf16 %v701_v60, %v700_v59  ;;  %v878_v1 = vpop.f32.mrf.mxu1  ;;  %v690_v5 = vmul.f32 0.17677669, %v653_v63 }
  0xf8   : > { %1821 = vst [vmem:[%s2658_s25] sm:$0xff] %v1820_v62  }
  0xf9   : > { %1862 = vst [vmem:[%s2654_s20 + $0x30] sm:$0xff] %v1770_v0  }
  0xfb   : > { %v683_v2 = vpop.f32.mrf.mxu3 }
  0xfc   : > { %v702_v11 = vmul.f32 0.17677669, %v683_v2 }
  0xfd   : > { %v1087_v3 = vpop.f32.mrf.mxu2  ;;  %v655_v4 = vpop.f32.mrf.mxu0 }
  0xfe   : > { %v691_v6 = vmul.f32 0.17677669, %v655_v4  ;;  %v880_v7 = vpop.f32.mrf.mxu1 }
  0xff   : > { %v1785_v8 = vpack.c.bf16 %v880_v7, %v878_v1 }
 0x100   : > { %v1745_v9 = vpack.c.bf16 %v691_v6, %v690_v5 }
 0x101   : > { %1864 = vst [vmem:[%s2650_s13 + $0x8] sm:$0xff] %v1785_v8  }
 0x102   : > { %1857 = vst [vmem:[%s2654_s20 + $0x8] sm:$0xff] %v1745_v9  }
 0x103   : > { %v685_v10 = vpop.f32.mrf.mxu3 }
 0x104   : > { %v703_v12 = vmul.f32 0.17677669, %v685_v10 }
 0x105   : > { %v1089_v13 = vpop.f32.mrf.mxu2  ;;  %v658_v15 = vpop.f32.mrf.mxu0 }
 0x106   : > { %v1825_v14 = vpack.c.bf16 %v1089_v13, %v1087_v3  ;;  %v1775_v16 = vpack.c.bf16 %v703_v12, %v702_v11  ;;  %v883_v17 = vpop.f32.mrf.mxu1  ;;  %v692_v21 = vmul.f32 0.17677669, %v658_v15 }
 0x108   : > { %1871 = vst [vmem:[%s2658_s25 + $0x8] sm:$0xff] %v1825_v14  }
 0x109   : > { %1863 = vst [vmem:[%s2654_s20 + $0x38] sm:$0xff] %v1775_v16  }
 0x10b   : > { %v903_v18 = vpop.f32.mrf.mxu3 }
 0x10d   : > { %v1092_v19 = vpop.f32.mrf.mxu2  ;;  %v660_v20 = vpop.f32.mrf.mxu0 }
 0x10e   : > { %v693_v22 = vmul.f32 0.17677669, %v660_v20  ;;  %v885_v23 = vpop.f32.mrf.mxu1 }
 0x10f   : > { %v1790_v24 = vpack.c.bf16 %v885_v23, %v883_v17 }
 0x110   : > { %v1750_v25 = vpack.c.bf16 %v693_v22, %v692_v21 }
 0x111   : > { %1865 = vst [vmem:[%s2650_s13 + $0x10] sm:$0xff] %v1790_v24  }
 0x112   : > { %1858 = vst [vmem:[%s2654_s20 + $0x10] sm:$0xff] %v1750_v25  }
 0x113   : > { %v905_v26 = vpop.f32.mrf.mxu3 }
 0x114   : > { %v1810_v27 = vpack.c.bf16 %v905_v26, %v903_v18 }
 0x115   : > { %v1094_v28 = vpop.f32.mrf.mxu2  ;;  %v663_v30 = vpop.f32.mrf.mxu0 }
 0x116   : > { %v1830_v29 = vpack.c.bf16 %v1094_v28, %v1092_v19  ;;  %1869 = vst [vmem:[%s2650_s13 + $0x30] sm:$0xff] %v1810_v27   ;;  %v888_v31 = vpop.f32.mrf.mxu1  ;;  %v694_v35 = vmul.f32 0.17677669, %v663_v30 }
 0x118   : > { %1872 = vst [vmem:[%s2658_s25 + $0x10] sm:$0xff] %v1830_v29  }
 0x11b   : > { %v908_v32 = vpop.f32.mrf.mxu3 }
 0x11d   : > { %v1097_v33 = vpop.f32.mrf.mxu2  ;;  %v665_v34 = vpop.f32.mrf.mxu0 }
 0x11e   : > { %v695_v36 = vmul.f32 0.17677669, %v665_v34  ;;  %v890_v37 = vpop.f32.mrf.mxu1 }
 0x11f   : > { %v1795_v38 = vpack.c.bf16 %v890_v37, %v888_v31 }
 0x120   : > { %v1755_v39 = vpack.c.bf16 %v695_v36, %v694_v35 }
 0x121   : > { %1866 = vst [vmem:[%s2650_s13 + $0x18] sm:$0xff] %v1795_v38  }
 0x122   : > { %1859 = vst [vmem:[%s2654_s20 + $0x18] sm:$0xff] %v1755_v39  }
 0x123   : > { %v910_v40 = vpop.f32.mrf.mxu3 }
 0x124   : > { %v1815_v41 = vpack.c.bf16 %v910_v40, %v908_v32 }
 0x125   : > { %v1099_v42 = vpop.f32.mrf.mxu2  ;;  %v668_v44 = vpop.f32.mrf.mxu0 }
 0x126   : > { %v1835_v43 = vpack.c.bf16 %v1099_v42, %v1097_v33  ;;  %1870 = vst [vmem:[%s2650_s13 + $0x38] sm:$0xff] %v1815_v41   ;;  %v893_v45 = vpop.f32.mrf.mxu1  ;;  %v696_v49 = vmul.f32 0.17677669, %v668_v44 }
 0x128   : > { %1873 = vst [vmem:[%s2658_s25 + $0x18] sm:$0xff] %v1835_v43  }
 0x12b   : > { %v1112_v46 = vpop.f32.mrf.mxu3 }
 0x12d   : > { %v1102_v47 = vpop.f32.mrf.mxu2  ;;  %v670_v48 = vpop.f32.mrf.mxu0 }
 0x12e   : > { %v697_v50 = vmul.f32 0.17677669, %v670_v48  ;;  %v895_v51 = vpop.f32.mrf.mxu1 }
 0x12f   : > { %v1800_v52 = vpack.c.bf16 %v895_v51, %v893_v45 }
 0x130   : > { %v1760_v53 = vpack.c.bf16 %v697_v50, %v696_v49 }
 0x131   : > { %1867 = vst [vmem:[%s2650_s13 + $0x20] sm:$0xff] %v1800_v52  }
 0x132   : > { %1860 = vst [vmem:[%s2654_s20 + $0x20] sm:$0xff] %v1760_v53  }
 0x133   : > { %v1114_v54 = vpop.f32.mrf.mxu3 }
 0x134   : > { %v1850_v56 = vpack.c.bf16 %v1114_v54, %v1112_v46 }
 0x135   : > { %v1104_v55 = vpop.f32.mrf.mxu2  ;;  %v673_v58 = vpop.f32.mrf.mxu0 }
 0x136   : > { %v1840_v57 = vpack.c.bf16 %v1104_v55, %v1102_v47  ;;  %1876 = vst [vmem:[%s2658_s25 + $0x30] sm:$0xff] %v1850_v56   ;;  %v898_v59 = vpop.f32.mrf.mxu1  ;;  %v698_v63 = vmul.f32 0.17677669, %v673_v58 }
 0x138   : > { %1874 = vst [vmem:[%s2658_s25 + $0x20] sm:$0xff] %v1840_v57  }
 0x13b   : > { %v1117_v60 = vpop.f32.mrf.mxu3 }
 0x13d   : > { %v1107_v61 = vpop.f32.mrf.mxu2  ;;  %v675_v62 = vpop.f32.mrf.mxu0 }
 0x13e   : > { %v699_v0 = vmul.f32 0.17677669, %v675_v62  ;;  %v900_v1 = vpop.f32.mrf.mxu1 }
 0x13f   : > { %v1805_v2 = vpack.c.bf16 %v900_v1, %v898_v59 }
 0x140   : > { %v1765_v3 = vpack.c.bf16 %v699_v0, %v698_v63 }
 0x141   : > { %1868 = vst [vmem:[%s2650_s13 + $0x28] sm:$0xff] %v1805_v2   ;;  %s2219_s13 = scalar_lea.hbm %s2794_s7, 128 }
 0x142   : > { %1861 = vst [vmem:[%s2654_s20 + $0x28] sm:$0xff] %v1765_v3   ;;  %p2221_p10 = scmp.lt.s32.totalorder %s2219_s13, %s2215_s24 }
 0x143   : > { %v1119_v4 = vpop.f32.mrf.mxu3 }
 0x144   : > { %p2222_p13 = por %p2221_p10, %p2220_p8 }
 0x146   : > { %p2223_p0 = pnand %p2222_p13, %p2218_p4 }
 0x148   : > { %2226 = shalt.err (!%p2223_p0)
}
 0x149   : > { %s2360_s11 = smov 64   ;;  %s2361_s5 = smov 4   ;;  %v1109_v5 = vpop.f32.mrf.mxu2  ;;  %v1855_v6 = vpack.c.bf16 %v1119_v4, %v1117_v60 }
 0x14a   : > { %1921 = dma.vmem_to_hbm [thread:$0]  (%p2489_p5), %s2689_s15, 1024, %s1201_s30, %s2707_s18, %s2360_s11, %s2360_s11, %s2361_s5  }
 0x14b   : > { %s1155_s20 = scalar_lea.sflag [#allocation4], %s2567_s4  ;;  %s2241_s10 = sshra.s32 %s1182_s14, 4  ;;  %s2242_s10 = int_to_ptr.hbm [resolvable:$true] %s2241_s10 }
 0x14c   : > { %s2243_s1 = scalar_lea.hbm %s2242_s10, 64  ;;  %s2247_s3 = scalar_lea.hbm %s2793_s6, 128 }
 0x14d   : > { %p2244_p3 = scmp.ne.s32.totalorder %s2242_s10, %s2243_s1  ;;  %p2248_p12 = scmp.lt.s32.totalorder %s2242_s10, %s2793_s6 }
 0x14e   : > { %p2249_p1 = scmp.lt.s32.totalorder %s2247_s3, %s2243_s1 }
 0x14f   : > { %p2245_p7 = pnand %p2244_p3, %p2489_p5 }
 0x150   : > { %p2250_p2 = por %p2249_p1, %p2248_p12 }
 0x151   : > { %p2246_p9 = pneg %p2245_p7 }
 0x153   : > { %p2251_p4 = pnand %p2250_p2, %p2246_p9 }
 0x155   : > { %2254 = shalt.err (!%p2251_p4)
}
 0x156   : > { %1920 = dma.vmem_to_hbm [thread:$0]  (%p2489_p5), %s2687_s23, 1024, %s1182_s14, %s1155_s20, %s2360_s11, %s2360_s11, %s2361_s5   ;;  %v1845_v7 = vpack.c.bf16 %v1109_v5, %v1107_v61 }
 0x157   : > { %1877 = vst [vmem:[%s2658_s25 + $0x38] sm:$0xff] %v1855_v6   ;;  %s2269_s4 = sshra.s32 %s1220_s12, 4  ;;  %s2275_s13 = scalar_lea.hbm %s2795_s8, 128  ;;  %s2270_s4 = int_to_ptr.hbm [resolvable:$true] %s2269_s4 }
 0x158   : > { %1875 = vst [vmem:[%s2658_s25 + $0x28] sm:$0xff] %v1845_v7   ;;  %s2271_s15 = scalar_lea.hbm %s2270_s4, 64  ;;  %p2276_p0 = scmp.lt.s32.totalorder %s2270_s4, %s2795_s8 }
 0x159   : > { %p2272_p8 = scmp.ne.s32.totalorder %s2270_s4, %s2271_s15  ;;  %p2277_p3 = scmp.lt.s32.totalorder %s2275_s13, %s2271_s15 }
 0x15b   : > { %p2273_p10 = pnand %p2272_p8, %p2489_p5  ;;  %p2278_p7 = por %p2277_p3, %p2276_p0 }
 0x15d   : > { %p2274_p13 = pneg %p2273_p10 }
 0x15f   : > { %p2279_p9 = pnand %p2278_p7, %p2274_p13 }
 0x161   : > { %2282 = shalt.err (!%p2279_p9)
}
 0x162   : > { %1922 = dma.vmem_to_hbm [thread:$0]  (%p2489_p5), %s1218_s9, 1024, %s1220_s12, %s2707_s18, %s2360_s11, %s2360_s11, %s2361_s5  }
 0x163 PF: > { %s2831_s25 = sld [smem:[#allocation23_spill]]  ;;  %p1947_p12 = pnand %p1460_p11, %p2454_p6 }
 0x164   : > { %s2833_s14 = sld [smem:[#allocation25_spill]] }
 0x165   : > { %p1948_p1 = pneg %p1947_p12 }
 0x169   : > { %s1234_s20 = sand.u32 1, %s2831_s25  }
 0x16a   : > { %s1235_s10 = scalar_lea.sflag [#allocation4], %s1234_s20 }
 0x16b   : > { %2324 = dma.done.wait (%p1948_p1), %s1235_s10, 1024  }
 0x16c   : > { %2326 = vsyncadd (%p1948_p1), %s1235_s10, 4294966272  ;;  %s2834_s1 = sadd.s32 4294967294, %s2833_s14  }
 0x16d   : > { %s1244_s26 = sand.u32 1, %s2834_s1  }
 0x16e   : > { %s1245_s19 = scalar_lea.sflag [#allocation15], %s1244_s26 }
 0x16f   : > { %2328 = dma.done.wait (%p1948_p1), %s1245_s19, 2048  }
 0x170   : > { %2330 = vsyncadd (%p1948_p1), %s1245_s19, 4294965248  ;;  %s33_s10 = sadd.s32 1, %s2833_s14   ;;  %s2835_s9 = sld [smem:[#allocation28_spill]] }
 0x171   : > { %p30_p5 = scmp.ge.s32.totalorder %s33_s10, 4   ;;  %s2836_s30 = sld [smem:[#allocation24_spill]] }
 0x172   : > { %s2837_s12 = sld [smem:[#allocation27_spill]]  ;;  %s2838_s27 = smov %s2337_s28 }
 0x173   : > { %s2839_s28 = smov %s2341_s29 }
 0x174   :  { %32 = sbr.rel (!%p30_p5) target bundleno = 17 (0x11), region = 157 }
 0x176   : > { %s2840_s29 = smov %s2835_s9 }
 0x178   : > { %s2841_s9 = smov %s2837_s12 }
 0x179   :  { %1261 = vsyncpa [#allocation3], 1 }
 0x17a   :  { %1263 = vsyncpa [#allocation3 + $0x1], 1 }
 0x17b   :  { %1264 = vsyncpa [#allocation6], 1 }
 0x17c   :  { %1266 = vsyncpa [#allocation6 + $0x1], 1 }
 0x17d   :  { %1267 = vsyncpa [#allocation9], 1 }
 0x17e   :  { %1268 = vsyncpa [#allocation12], 1 }
 0x17f   :  { %1269 = vsyncpa [#allocation4], 1 }
 0x180   :  { %1271 = vsyncpa [#allocation4 + $0x1], 1 }
 0x181   :  { %1272 = vsyncpa [#allocation15], 1 }
 0x182   :  { %1274 = vsyncpa [#allocation15 + $0x1], 1 }

</bundles_post_ra>
